<compile_context>
chip_gen: v7x
topology: tpu7x:2x2x1
jax: 0.10.0
libtpu: 0.0.40
codegen_flags: <defaults>
</compile_context>

<pallas_src>
import functools

import jax
import jax.numpy as jnp
from jax.experimental import pallas as pl
from jax.experimental.pallas import tpu as pltpu


# ----------------------------- config (LMConfig) -----------------------------
class Cfg:
    dim = 32
    multiple_of = 64
    hidden_dim = None            # derived below, matches FeedForward.__init__
    dropout = 0.0                # inference => dropout is a no-op
    n_routed_experts = 4
    num_experts_per_tok = 2
    norm_topk_prob = True
    scoring_func = "softmax"
    aux_loss_alpha = 0.0
    seq_aux = True
    n_shared_experts = 1         # not None => shared expert branch is active


def _derive_hidden(cfg):
    if cfg.hidden_dim is None:
        hd = 4 * cfg.dim
        hd = int(2 * hd / 3)
        cfg.hidden_dim = cfg.multiple_of * ((hd + cfg.multiple_of - 1) // cfg.multiple_of)
    return cfg.hidden_dim


# --------------------- one-time weight preparation (hoisted) -------------------
def prepare_moe_weights(params, cfg):
    """Done once at weight-load time, NOT per forward call.

    Returns:
      gate_w : (E, D) f32
      w13    : (D, 2*EH) bf16   SLAB layout: columns [0:EH) = W1_e^T for
                                e = 0..E (expert-major), columns [EH:2EH) = W3_e^T
      w2     : (EH, 128) bf16   rows per expert e: W2_e^T, output dim
                                zero-padded D -> 128 for a lane-dense store
      (EH = (E+1) * H, expert E = shared expert)
    """
    E, H, D = cfg.n_routed_experts, cfg.hidden_dim, cfg.dim
    Dp = 128  # lane-dense padded output width

    w1 = jnp.concatenate([params["w1"], params["sh_w1"][None]], axis=0)  # (E+1, H, D)
    w3 = jnp.concatenate([params["w3"], params["sh_w3"][None]], axis=0)  # (E+1, H, D)
    w2 = jnp.concatenate([params["w2"], params["sh_w2"][None]], axis=0)  # (E+1, D, H)

    n_exp = E + 1
    EH = n_exp * H

    # slab-ordered fused up-projection weight: (D, 2*EH) = [W1_all^T | W3_all^T]
    w1t = jnp.transpose(w1, (2, 0, 1)).reshape(D, EH)   # (D, (E+1)*H), expert-major cols
    w3t = jnp.transpose(w3, (2, 0, 1)).reshape(D, EH)
    w13 = jnp.concatenate([w1t, w3t], axis=1)            # (D, 2*EH)

    # stacked down-projection weight: (EH, Dp), zero-padded beyond D
    w2t = jnp.transpose(w2, (0, 2, 1)).reshape(EH, D)
    w2t = jnp.pad(w2t, ((0, 0), (0, Dp - D)))

    # TODO(synk): for real model dims (large D/H/E) switch to scalar-prefetch
    # grouped routing (only routed experts DMA'd), quantize weights to fp8 (v7x)
    # / int8 (v6e), stage the constant-index weight blocks single-buffered
    # (pl.Buffered(1) or a one-shot make_async_copy), and set vmem_limit_bytes.
    return {
        "gate_w": params["gate_w"].astype(jnp.float32),
        "w13": w13.astype(jnp.bfloat16),
        "w2": w2t.astype(jnp.bfloat16),
    }


# ------------------------------- Pallas kernel --------------------------------
def _moe_fused_kernel(x_ref, w13_ref, w2_ref, gw_ref, o_ref, *, EH):
    """Single grid step: all experts fused, two MXU dots, one slab SwiGLU.

    x_ref  : (TM, D)      bf16 token tile
    w13_ref: (D, 2*EH)    bf16 slab up-projection  [W1_all^T | W3_all^T]
    w2_ref : (EH, Dp)     bf16 stacked down-projection (all experts)
    gw_ref : (TM, EH)     bf16 pre-expanded per-token gate weights
    o_ref  : (TM, Dp)     bf16 lane-dense output (Dp = 128)
    """
    x = x_ref[...]                                                        # (TM, D)
    up = jnp.dot(x, w13_ref[...], preferred_element_type=jnp.float32)    # (TM, 2*EH) f32

    h1 = up[:, :EH]
    h3 = up[:, EH:]
    # SwiGLU + gate scaling, one full-slab f32 VPU op (gw promotes bf16->f32)
    h = (h1 * jax.nn.sigmoid(h1)) * h3 * gw_ref[...]                      # (TM, EH) f32
    h = h.astype(jnp.bfloat16)                                            # one slab cast

    o_ref[...] = jnp.dot(h, w2_ref[...],
                         preferred_element_type=jnp.float32).astype(o_ref.dtype)


def _choose_tm(T):
    # Bounded token tile: weights are VMEM-resident (constant index_map), so a
    # larger TM amortizes the ~0.35 us/step overhead; cap at 512 to keep the
    # f32 `up` intermediate small and pipelining alive on all generations.
    if T >= 512:
        return 512
    if T >= 256:
        return 256
    return ((T + 7) // 8) * 8   # small T: one tile, rounded up to sublane multiple


def moe_feedforward(x, prepped, cfg):
    """x: (bsz, seq, dim) f32, prepped: output of prepare_moe_weights."""
    bsz, seq_len, D = x.shape
    T = bsz * seq_len
    H = cfg.hidden_dim
    E = cfg.n_routed_experts
    k = cfg.num_experts_per_tok
    n_exp = E + 1
    EH = n_exp * H
    Dp = prepped["w2"].shape[1]

    xf = x.reshape(T, D).astype(jnp.float32)

    # ---------------- gate (glue, plain JAX, f32): softmax + top-k -------------
    logits = xf @ prepped["gate_w"].T                    # (T, E)
    scores = jax.nn.softmax(logits, axis=-1)
    topk_w, topk_idx = jax.lax.top_k(scores, k)          # (T, k)
    if k > 1 and cfg.norm_topk_prob:
        topk_w = topk_w / (jnp.sum(topk_w, axis=-1, keepdims=True) + 1e-20)
    one_hot = jax.nn.one_hot(topk_idx, E, dtype=jnp.float32)             # (T, k, E)
    gw = jnp.sum(one_hot * topk_w[..., None], axis=1)                    # (T, E)
    gw = jnp.concatenate([gw, jnp.ones((T, 1), jnp.float32)], axis=1)    # (T, E+1)

    # pre-expand gate weights to the hidden slab layout: (T, EH), expert-major
    gw_rep = jnp.repeat(gw, H, axis=1).astype(jnp.bfloat16)              # (T, EH)

    x_bf16 = xf.astype(jnp.bfloat16)

    # bounded token tile + zero-padded last tile (padded rows: gw = 0)
    TM = _choose_tm(T)
    Tp = pl.cdiv(T, TM) * TM
    if Tp != T:
        x_bf16 = jnp.pad(x_bf16, ((0, Tp - T), (0, 0)))
        gw_rep = jnp.pad(gw_rep, ((0, Tp - T), (0, 0)))
    grid = (Tp // TM,)

    out = pl.pallas_call(
        functools.partial(_moe_fused_kernel, EH=EH),
        out_shape=jax.ShapeDtypeStruct((Tp, Dp), jnp.bfloat16),
        grid_spec=pltpu.PrefetchScalarGridSpec(
            num_scalar_prefetch=0,
            grid=grid,
            in_specs=[
                pl.BlockSpec((TM, D), lambda i: (i, 0)),          # x tile
                pl.BlockSpec((D, 2 * EH), lambda i: (0, 0)),      # slab W1||W3 (resident)
                pl.BlockSpec((EH, Dp), lambda i: (0, 0)),         # stacked W2   (resident)
                pl.BlockSpec((TM, EH), lambda i: (i, 0)),         # expanded gate weights
            ],
            out_specs=pl.BlockSpec((TM, Dp), lambda i: (i, 0)),
        ),
        compiler_params=pltpu.CompilerParams(
            dimension_semantics=("parallel",)),
    )(x_bf16, prepped["w13"], prepped["w2"], gw_rep)

    return out[:T, :D].astype(jnp.float32).reshape(bsz, seq_len, D)


# ------------------------------ pure-JAX reference ----------------------------
def moe_feedforward_ref(x, params, cfg):
    bsz, seq_len, dim = x.shape
    T = bsz * seq_len
    E = cfg.n_routed_experts
    k = cfg.num_experts_per_tok
    xf = x.reshape(T, dim)

    logits = xf @ params["gate_w"].T
    scores = jax.nn.softmax(logits, axis=-1)
    topk_w, topk_idx = jax.lax.top_k(scores, k)
    if k > 1 and cfg.norm_topk_prob:
        topk_w = topk_w / (jnp.sum(topk_w, axis=-1, keepdims=True) + 1e-20)
    one_hot = jax.nn.one_hot(topk_idx, E, dtype=jnp.float32)
    gw = jnp.sum(one_hot * topk_w[..., None], axis=1)  # (T, E)

    def ffn(xx, w1, w2, w3):
        h1 = xx @ w1.T
        h3 = xx @ w3.T
        return (h1 * jax.nn.sigmoid(h1) * h3) @ w2.T

    y = jnp.zeros_like(xf)
    for e in range(E):
        y = y + gw[:, e:e + 1] * ffn(xf, params["w1"][e], params["w2"][e], params["w3"][e])
    y = y + ffn(xf, params["sh_w1"], params["sh_w2"], params["sh_w3"])
    return y.reshape(bsz, seq_len, dim)


# ----------------------------------- main -------------------------------------
if __name__ == "__main__":
    cfg = Cfg()
    _derive_hidden(cfg)
    D, H, E = cfg.dim, cfg.hidden_dim, cfg.n_routed_experts

    key = jax.random.PRNGKey(0)
    ks = jax.random.split(key, 9)

    # deterministic synthetic weights (nn.Linear weight shape = (out, in))
    scale = 0.1
    params = {
        "gate_w": scale * jax.random.normal(ks[0], (E, D), jnp.float32),
        "w1": scale * jax.random.normal(ks[1], (E, H, D), jnp.float32),
        "w2": scale * jax.random.normal(ks[2], (E, D, H), jnp.float32),
        "w3": scale * jax.random.normal(ks[3], (E, H, D), jnp.float32),
        "sh_w1": scale * jax.random.normal(ks[4], (H, D), jnp.float32),
        "sh_w2": scale * jax.random.normal(ks[5], (D, H), jnp.float32),
        "sh_w3": scale * jax.random.normal(ks[6], (H, D), jnp.float32),
    }

    bsz, seq_len = 2, 8
    x = jax.random.normal(ks[7], (bsz, seq_len, D), jnp.float32)

    # one-time weight prep (hoisted out of the per-call path)
    prepped = prepare_moe_weights(params, cfg)
    prepped = jax.tree_util.tree_map(jax.block_until_ready, prepped)

    fwd = jax.jit(functools.partial(moe_feedforward, cfg=cfg))
    y = fwd(x, prepped)
    y = jax.block_until_ready(y)

    y_ref = moe_feedforward_ref(x, params, cfg)
    # bf16 matmul inputs / bf16 gate weights (f32 accumulation) => looser tolerance
    # vs f32 reference; explicit inference-precision choice.
    assert jnp.allclose(y, y_ref, atol=5e-2, rtol=5e-2), "mismatch vs reference"

    # TODO(synk): aux_loss (training-only) and dropout (p=0) are no-ops for
    # inference and are not emitted.
    print("KERNEL_OK")
</pallas_src>

<mosaic_0001>
module attributes {stable_mosaic.version = 11 : i64} {
  func.func @_moe_fused_kernel(%arg0: i32, %arg1: memref<16x32xbf16, #tpu.memory_space<vmem>>, %arg2: memref<32x1280xbf16, #tpu.memory_space<vmem>>, %arg3: memref<640x128xbf16, #tpu.memory_space<vmem>>, %arg4: memref<16x640xbf16, #tpu.memory_space<vmem>>, %arg5: memref<16x128xbf16, #tpu.memory_space<vmem>>) attributes {dimension_semantics = [#tpu.dimension_semantics<parallel>], iteration_bounds = array<i64: 1>, scalar_prefetch = 0 : i64, scratch_operands = 0 : i64, tpu.core_type = #tpu.core_type<tc>, window_params = [{transform_indices = @transform_0, window_bounds = array<i64: 16, 32>}, {pipeline_mode = #tpu.pipeline_mode<synchronous>, transform_indices = @transform_1, window_bounds = array<i64: 32, 1280>}, {pipeline_mode = #tpu.pipeline_mode<synchronous>, transform_indices = @transform_2, window_bounds = array<i64: 640, 128>}, {transform_indices = @transform_3, window_bounds = array<i64: 16, 640>}, {transform_indices = @transform_4, window_bounds = array<i64: 16, 128>}]} {
    %c0 = arith.constant 0 : index
    %c0_0 = arith.constant 0 : index
    %0 = vector.load %arg1[%c0, %c0_0] : memref<16x32xbf16, #tpu.memory_space<vmem>>, vector<16x32xbf16>
    %c0_1 = arith.constant 0 : index
    %c0_2 = arith.constant 0 : index
    %1 = vector.load %arg2[%c0_1, %c0_2] : memref<32x1280xbf16, #tpu.memory_space<vmem>>, vector<32x1280xbf16>
    %cst = arith.constant dense<0.000000e+00> : vector<16x1280xf32>
    %2 = tpu.matmul %0, %1, %cst {dimension_numbers = #tpu.dot_dimension_numbers<[1], [0], [0], [1], [0, 0, 1, 1], [], []>} : vector<16x32xbf16>, vector<32x1280xbf16>, vector<16x1280xf32> -> vector<16x1280xf32>
    %3 = vector.extract_strided_slice %2 {offsets = [0, 0], sizes = [16, 640], strides = [1, 1]} : vector<16x1280xf32> to vector<16x640xf32>
    %4 = vector.extract_strided_slice %2 {offsets = [0, 640], sizes = [16, 640], strides = [1, 1]} : vector<16x1280xf32> to vector<16x640xf32>
    %5 = arith.negf %3 : vector<16x640xf32>
    %6 = math.exp %5 : vector<16x640xf32>
    %cst_3 = arith.constant 1.000000e+00 : f32
    %7 = vector.broadcast %cst_3 : f32 to vector<16x640xf32>
    %8 = arith.addf %7, %6 : vector<16x640xf32>
    %9 = arith.divf %7, %8 : vector<16x640xf32>
    %10 = arith.mulf %3, %9 : vector<16x640xf32>
    %11 = arith.mulf %10, %4 : vector<16x640xf32>
    %c0_4 = arith.constant 0 : index
    %c0_5 = arith.constant 0 : index
    %12 = vector.load %arg4[%c0_4, %c0_5] : memref<16x640xbf16, #tpu.memory_space<vmem>>, vector<16x640xbf16>
    %13 = arith.extf %12 : vector<16x640xbf16> to vector<16x640xf32>
    %14 = arith.mulf %11, %13 : vector<16x640xf32>
    %15 = arith.truncf %14 : vector<16x640xf32> to vector<16x640xbf16>
    %c0_6 = arith.constant 0 : index
    %c0_7 = arith.constant 0 : index
    %16 = vector.load %arg3[%c0_6, %c0_7] : memref<640x128xbf16, #tpu.memory_space<vmem>>, vector<640x128xbf16>
    %cst_8 = arith.constant dense<0.000000e+00> : vector<16x128xf32>
    %17 = tpu.matmul %15, %16, %cst_8 {dimension_numbers = #tpu.dot_dimension_numbers<[1], [0], [0], [1], [0, 0, 1, 1], [], []>} : vector<16x640xbf16>, vector<640x128xbf16>, vector<16x128xf32> -> vector<16x128xf32>
    %18 = arith.truncf %17 : vector<16x128xf32> to vector<16x128xbf16>
    %c0_9 = arith.constant 0 : index
    %c0_10 = arith.constant 0 : index
    %19 = vector.load %arg5[%c0_9, %c0_10] : memref<16x128xbf16, #tpu.memory_space<vmem>>, vector<16x128xbf16>
    tpu.vector_store %arg5[%c0_9, %c0_10], %18 {strides = array<i32>} : memref<16x128xbf16, #tpu.memory_space<vmem>>, vector<16x128xbf16>,
    return
  }
  func.func @transform_0(%arg0: i32) -> (i32, i32) {
    %c0_i32 = arith.constant 0 : i32
    %c0_i32_0 = arith.constant 0 : i32
    return %arg0, %c0_i32 : i32, i32
  }
  func.func @transform_1(%arg0: i32) -> (i32, i32) {
    %c0_i32 = arith.constant 0 : i32
    %c0_i32_0 = arith.constant 0 : i32
    %c0_i32_1 = arith.constant 0 : i32
    return %c0_i32, %c0_i32_0 : i32, i32
  }
  func.func @transform_2(%arg0: i32) -> (i32, i32) {
    %c0_i32 = arith.constant 0 : i32
    %c0_i32_0 = arith.constant 0 : i32
    %c0_i32_1 = arith.constant 0 : i32
    return %c0_i32, %c0_i32_0 : i32, i32
  }
  func.func @transform_3(%arg0: i32) -> (i32, i32) {
    %c0_i32 = arith.constant 0 : i32
    %c0_i32_0 = arith.constant 0 : i32
    return %arg0, %c0_i32 : i32, i32
  }
  func.func @transform_4(%arg0: i32) -> (i32, i32) {
    %c0_i32 = arith.constant 0 : i32
    %c0_i32_0 = arith.constant 0 : i32
    return %arg0, %c0_i32 : i32, i32
  }
}

</mosaic_0001>

<bundles_post_ra>
// kernel: moe_feedforward.1
= control target key start
LH: loop header
LB: loop body
LE: loop exit
PB: predicated region body
PF: predicated region fallthrough
CT: control target
= control target key end

     0   :  { %9 = vsyncpa [#allocation3], 0  ;;  %s1246_s15 = smov [#allocation2]   ;;  %s1496_s0 = inlined_call_operand.vmem [shape: bf16[16,32], index: 0, kind: input, shape index: {}]   ;;  %s1497_s1 = inlined_call_operand.hbm [shape: bf16[32,1280], index: 1, kind: input, shape index: {}]   ;;  %s1498_s2 = inlined_call_operand.vmem [shape: bf16[640,128], index: 2, kind: input, shape index: {}]   ;;  %s1499_s3 = inlined_call_operand.vmem [shape: bf16[16,640], index: 3, kind: input, shape index: {}]   ;;  %s1500_s4 = inlined_call_operand.vmem [shape: bf16[16,128], index: 4, kind: output, shape index: {}]  }
   0x1   :  { %s17_s16 = sshll.u32 %s1246_s15, 4  ;;  %s1222_s19 = scalar_lea.hbm %s1497_s1, 2560  ;;  %s18_s16 = int_to_ptr.vmem [resolvable:$true] %s17_s16 }
   0x2   :  { %p1223_p0 = scmp.ne.s32.totalorder %s1497_s1, %s1222_s19  ;;  %p1226_p1 = scmp.lt.u32.totalorder %s1222_s19, %s1497_s1 }
   0x4   :  { %p1228_p2 = pnand %p1226_p1, %p1223_p0 }
   0x6   :  { %1231 = shalt.err (!%p1228_p2)
}
   0x7   :  { %s1232_s24 = scalar_lea.vmem %s18_s16, 2560  ;;  %p1237_p4 = scmp.lt.s32.totalorder %s18_s16, %s18_s16 }
   0x8   :  { %p1233_p3 = scmp.ne.s32.totalorder %s18_s16, %s1232_s24  ;;  %p1238_p5 = scmp.lt.s32.totalorder %s1232_s24, %s1232_s24 }
   0xa   :  { %p1239_p6 = por %p1238_p5, %p1237_p4 }
   0xc   :  { %p1240_p7 = pnand %p1239_p6, %p1233_p3 }
   0xe   :  { %1243 = shalt.err (!%p1240_p7)
}
   0xf   :  { %s1247_s25 = smov 640   ;;  %s1248_s26 = smov 40  }
  0x10   :  { %23 = dma.hbm_to_vmem [thread:$0]  %s1497_s1, 2560, %s18_s16, [#allocation3], %s1247_s25, %s1247_s25, %s1248_s26  }
  0x11   :  { %1244 = dma.done.wait [#allocation3], 2560  }
  0x12   :  { %1245 = vsyncadd [#allocation3], 4294964736  ;;  %v1249_v0 = vmov 0   ;;  %v1111_v1 = vld [vmem:[#allocation2 + $0x4] ss:$40 sps:$4 sm:$0xff]   ;;  %vm159_vm0 = vcmask 261120  }
  0x13   :  { %195 = vmatprep.mubr.bf16.mxu0 %v1249_v0  ;;  %324 = vmatprep.mubr.bf16.mxu1 %v1249_v0  ;;  %v1113_v2 = vld [vmem:[#allocation2] ss:$40 sps:$4 sm:$0xff]   ;;  %v1114_v3 = vld [vmem:[#allocation2 + $0x54] ss:$40 sps:$4 sm:$0xff]   ;;  %v1116_v4 = vld [vmem:[#allocation2 + $0x50] ss:$40 sps:$4 sm:$0xff]  }
  0x14   :  { %163 = vmatprep.subr.bf16.mxu0 %v1111_v1  ;;  %v1120_v5 = vld [vmem:[#allocation2 + $0xc] ss:$40 sps:$4 sm:$0xff]   ;;  %v1117_v6 = vld [vmem:[%s1496_s0] sm:$0xff]   ;;  %v1118_v7 = vld [vmem:[#allocation2 + $0x8] ss:$40 sps:$4 sm:$0xff]   ;;  %v1250_v51 = vmov 0.0  }
  0x15   :  { %164 = vmatpush1.bf16.msra.mxu0 %v1113_v2  ;;  %v1123_v8 = vld [vmem:[#allocation2 + $0x5c] ss:$40 sps:$4 sm:$0xff]   ;;  %v1132_v10 = vld [vmem:[#allocation2 + $0x18] ss:$40 sps:$4 sm:$0xff]   ;;  %v1133_v12 = vld [vmem:[#allocation2 + $0x6c] ss:$40 sps:$4 sm:$0xff]  }
  0x16   :  { %165 = vmatprep.subr.bf16.mxu0 %v1114_v3  ;;  %v1130_v9 = vld [vmem:[#allocation2 + $0x1c] ss:$40 sps:$4 sm:$0xff]   ;;  %v1121_v11 = vld [vmem:[#allocation2 + $0x58] ss:$40 sps:$4 sm:$0xff]   ;;  %v1135_v15 = vld [vmem:[#allocation2 + $0x68] ss:$40 sps:$4 sm:$0xff]  }
  0x17   :  { %v1126_v13 = vld [vmem:[#allocation2 + $0x14] ss:$40 sps:$4 sm:$0xff]   ;;  %292 = vmatprep.subr.bf16.mxu1 %v1130_v9  ;;  %v1124_v14 = vld [vmem:[#allocation2 + $0x10] ss:$40 sps:$4 sm:$0xff]   ;;  %v1129_v16 = vld [vmem:[#allocation2 + $0x64] ss:$40 sps:$4 sm:$0xff]  }
  0x18   :  { %293 = vmatpush1.bf16.msra.mxu1 %v1132_v10  ;;  %v1127_v17 = vld [vmem:[#allocation2 + $0x60] ss:$40 sps:$4 sm:$0xff]   ;;  %v1138_v18 = vld [vmem:[#allocation2 + $0x24] ss:$40 sps:$4 sm:$0xff]   ;;  %v1141_v20 = vld [vmem:[#allocation2 + $0x74] ss:$40 sps:$4 sm:$0xff]  }
  0x19   :  { %166 = vmatpush1.bf16.msra.mxu0 %v1116_v4  ;;  %294 = vmatprep.subr.bf16.mxu1 %v1133_v12  ;;  %v1136_v19 = vld [vmem:[#allocation2 + $0x20] ss:$40 sps:$4 sm:$0xff]   ;;  %v1139_v21 = vld [vmem:[#allocation2 + $0x70] ss:$40 sps:$4 sm:$0xff]   ;;  %vm1251_vm1 = vmmov 0  }
  0x1a   :  { %206 = vmatprep.subr.bf16.mxu0 %v1120_v5  ;;  %v1142_v22 = vld [vmem:[%s1498_s2 + $0x40] sm:$0xff]   ;;  %v1144_v24 = vld [vmem:[%s1498_s2 + $0x48] sm:$0xff]   ;;  %v1146_v26 = vld [vmem:[%s1498_s2 + $0x50] sm:$0xff]  }
  0x1b   :  { %v1143_v23 = vld [vmem:[%s1498_s2] sm:$0xff]   ;;  %v1145_v25 = vld [vmem:[%s1498_s2 + $0x8] sm:$0xff]   ;;  %v1147_v27 = vld [vmem:[%s1498_s2 + $0x10] sm:$0xff]  }
  0x1c   :  { %968 = vmatmul.mubr.msk.bf16.vlgmr.msra.gmra.mrb[0].mxu0 %vm159_vm0, %v1117_v6  ;;  %295 = vmatpush1.bf16.msra.mxu1 %v1135_v15  ;;  %v1148_v28 = vld [vmem:[%s1498_s2 + $0xc0] sm:$0xff]   ;;  %v1150_v30 = vld [vmem:[%s1498_s2 + $0x58] sm:$0xff]   ;;  %v1152_v32 = vld [vmem:[%s1498_s2 + $0xc8] sm:$0xff]  }
  0x1d   :  { %207 = vmatpush1.bf16.msra.mxu0 %v1118_v7  ;;  %238 = vmatprep.mubr.bf16.mxu0 %v1249_v0  ;;  %v1149_v29 = vld [vmem:[%s1498_s2 + $0x80] sm:$0xff]   ;;  %v1151_v31 = vld [vmem:[%s1498_s2 + $0x18] sm:$0xff]   ;;  %v1153_v33 = vld [vmem:[%s1498_s2 + $0x88] sm:$0xff]  }
  0x1e   :  { %208 = vmatprep.subr.bf16.mxu0 %v1123_v8  ;;  %1032 = vmatprep.subr.bf16.mxu1 %v1142_v22  ;;  %v1154_v34 = vld [vmem:[%s1498_s2 + $0x60] sm:$0xff]   ;;  %v1156_v36 = vld [vmem:[%s1498_s2 + $0xd0] sm:$0xff]   ;;  %v1158_v38 = vld [vmem:[%s1498_s2 + $0x68] sm:$0xff]  }
  0x1f   :  { %971 = vmatmul.mubr.msk.bf16.vlgmr.msra.gmra.mrb[0].mxu1 %vm159_vm0, %v1117_v6  ;;  %v1155_v35 = vld [vmem:[%s1498_s2 + $0x20] sm:$0xff]   ;;  %v1157_v37 = vld [vmem:[%s1498_s2 + $0x90] sm:$0xff]   ;;  %v1159_v39 = vld [vmem:[%s1498_s2 + $0x28] sm:$0xff]  }
  0x20   :  { %1033 = vmatpush3.bf16.msra.mxu1 %v1143_v23  ;;  %v1160_v40 = vld [vmem:[%s1498_s2 + $0xd8] sm:$0xff]   ;;  %v1162_v42 = vld [vmem:[%s1498_s2 + $0x70] sm:$0xff]   ;;  %v1164_v44 = vld [vmem:[%s1498_s2 + $0xe0] sm:$0xff]  }
  0x21   :  { %209 = vmatpush1.bf16.msra.mxu0 %v1121_v11  ;;  %1034 = vmatprep.subr.bf16.mxu1 %v1144_v24  ;;  %v1161_v41 = vld [vmem:[%s1498_s2 + $0x98] sm:$0xff]   ;;  %v1163_v43 = vld [vmem:[%s1498_s2 + $0x30] sm:$0xff]   ;;  %v1165_v45 = vld [vmem:[%s1498_s2 + $0xa0] sm:$0xff]  }
  0x22   :  { %249 = vmatprep.subr.bf16.mxu0 %v1126_v13  ;;  %v1166_v46 = vld [vmem:[%s1498_s2 + $0x78] sm:$0xff]   ;;  %v1168_v48 = vld [vmem:[%s1498_s2 + $0xe8] sm:$0xff]   ;;  %v1170_v50 = vld [vmem:[%s1498_s2 + $0xf0] sm:$0xff]  }
  0x23   :  { %v1167_v47 = vld [vmem:[%s1498_s2 + $0x38] sm:$0xff]   ;;  %v1169_v49 = vld [vmem:[%s1498_s2 + $0xa8] sm:$0xff]   ;;  %v1172_v52 = vld [vmem:[%s1498_s2 + $0xb0] sm:$0xff]  }
  0x24   :  { %969 = vmatmul.mubr.msk.bf16.vlgmr.msra.gmra.mrb[4].mxu0 %vm159_vm0, %v1117_v6  ;;  %1035 = vmatpush3.bf16.msra.mxu1 %v1145_v25  ;;  %v1173_v53 = vld [vmem:[%s1498_s2 + $0xf8] sm:$0xff]  }
  0x25   :  { %250 = vmatpush1.bf16.msra.mxu0 %v1124_v14  ;;  %281 = vmatprep.mubr.bf16.mxu0 %v1249_v0  ;;  %v1175_v54 = vld [vmem:[%s1498_s2 + $0xb8] sm:$0xff]  }
  0x26   :  { %251 = vmatprep.subr.bf16.mxu0 %v1129_v16  ;;  %1036 = vmatprep.subr.bf16.mxu1 %v1146_v26 }
  0x28   :  { %1037 = vmatpush3.bf16.msra.mxu1 %v1147_v27 }
  0x29   :  { %252 = vmatpush1.bf16.msra.mxu0 %v1127_v17  ;;  %1038 = vmatprep.subr.bf16.mxu1 %v1150_v30 }
  0x2a   :  { %335 = vmatprep.subr.bf16.mxu0 %v1138_v18 }
  0x2c   :  { %970 = vmatmul.mubr.msk.bf16.vlgmr.msra.gmra.mrb[8].mxu0 %vm159_vm0, %v1117_v6  ;;  %1039 = vmatpush3.bf16.msra.mxu1 %v1151_v31 }
  0x2d   :  { %336 = vmatpush1.bf16.msra.mxu0 %v1136_v19  ;;  %367 = vmatprep.mubr.bf16.mxu0 %v1249_v0 }
  0x2e   :  { %337 = vmatprep.subr.bf16.mxu0 %v1141_v20  ;;  %1040 = vmatprep.subr.bf16.mxu1 %v1154_v34 }
  0x30   :  { %1041 = vmatpush3.bf16.msra.mxu1 %v1155_v35 }
  0x31   :  { %338 = vmatpush1.bf16.msra.mxu0 %v1139_v21  ;;  %1042 = vmatprep.subr.bf16.mxu1 %v1158_v38 }
  0x32   :  { %1054 = vmatprep.subr.bf16.mxu0 %v1148_v28 }
  0x34   :  { %972 = vmatmul.mubr.msk.bf16.vlgmr.msra.gmra.mrb[12].mxu0 %vm159_vm0, %v1117_v6  ;;  %1043 = vmatpush3.bf16.msra.mxu1 %v1159_v39 }
  0x35   :  { %1055 = vmatpush3.bf16.msra.mxu0 %v1149_v29  ;;  %1044 = vmatprep.subr.bf16.mxu1 %v1162_v42 }
  0x36   :  { %1056 = vmatprep.subr.bf16.mxu0 %v1152_v32 }
  0x38   :  { %1045 = vmatpush3.bf16.msra.mxu1 %v1163_v43 }
  0x39   :  { %1057 = vmatpush3.bf16.msra.mxu0 %v1153_v33  ;;  %1046 = vmatprep.subr.bf16.mxu1 %v1166_v46 }
  0x3a   :  { %1058 = vmatprep.subr.bf16.mxu0 %v1156_v36  ;;  %v458_v36 = vld [vmem:[%s1499_s3] sm:$0xff] }
  0x3c   :  { %1047 = vmatpush3.bf16.msra.mxu1 %v1167_v47  ;;  %v464_v47 = vunpack.c.l.bf16 %v458_v36 }
  0x3d   :  { %1059 = vmatpush3.bf16.msra.mxu0 %v1157_v37  ;;  %1085 = vmatprep.subr.bf16.mxu1 %v1250_v51  ;;  %v461_v37 = vld [vmem:[%s1499_s3 + $0x14] sm:$0xff] }
  0x3e   :  { %1060 = vmatprep.subr.bf16.mxu0 %v1160_v40 }
  0x41   :  { %1061 = vmatpush3.bf16.msra.mxu0 %v1161_v41 }
  0x42   :  { %1062 = vmatprep.subr.bf16.mxu0 %v1164_v44 }
  0x45   :  { %1063 = vmatpush3.bf16.msra.mxu0 %v1165_v45 }
  0x46   :  { %1064 = vmatprep.subr.bf16.mxu0 %v1168_v48  ;;  %v469_v48 = vunpack.c.l.bf16 %v461_v37 }
  0x49   :  { %1065 = vmatpush3.bf16.msra.mxu0 %v1169_v49 }
  0x4a   :  { %1066 = vmatprep.subr.bf16.mxu0 %v1170_v50 }
  0x4d   :  { %1067 = vmatpush3.bf16.msra.mxu0 %v1172_v52 }
  0x4e   :  { %1068 = vmatprep.subr.bf16.mxu0 %v1173_v53  ;;  %v465_v53 = vunpack.c.h.bf16 %v458_v36 }
  0x51   :  { %1069 = vmatpush3.bf16.msra.mxu0 %v1175_v54  ;;  %v470_v54 = vunpack.c.h.bf16 %v461_v37 }
  0xef   :  { %v1394_v55 = vpop.f32.mrb[0].mxu0 }
  0xf0   :  { %v973_v56 = vmul.f32 -1.442695, %v1394_v55  ;;  %v1397_v57 = vpop.f32.mrb[1].mxu0 }
  0xf1   :  { %v974_v58 = vmul.f32 -1.442695, %v1397_v57  ;;  %v1400_v59 = vpop.f32.mrb[2].mxu0 }
  0xf2   :  { %1182 = vpow2.f32 %v973_v56  ;;  %v978_v60 = vmul.f32 -1.442695, %v1400_v59  ;;  %v1403_v61 = vpop.f32.mrb[3].mxu0  ;;  %v326_v4 = vpop.f32.mrb[0].mxu1 }
  0xf3   :  { %1184 = vpow2.f32 %v974_v58  ;;  %v979_v62 = vmul.f32 -1.442695, %v1403_v61  ;;  %v1417_v7 = vpop.f32.mrb[1].mxu1 }
  0xf4   :  { %1186 = vpow2.f32 %v978_v60  ;;  %v330_v9 = vpop.f32.mrb[2].mxu1 }
  0xf5   :  { %1188 = vpow2.f32 %v979_v62  ;;  %v1420_v11 = vpop.f32.mrb[3].mxu1 }
  0xf7   :  { %v1406_v63 = vpop.f32.mrb[4].mxu0 }
  0xf8   :  { %v975_v0 = vmul.f32 -1.442695, %v1406_v63  ;;  %v1409_v1 = vpop.f32.mrb[5].mxu0 }
  0xf9   :  { %v976_v2 = vmul.f32 -1.442695, %v1409_v1  ;;  %v1412_v3 = vpop.f32.mrb[6].mxu0 }
  0xfa   :  { %1190 = vpow2.f32 %v975_v0  ;;  %v980_v5 = vmul.f32 -1.442695, %v1412_v3  ;;  %v1415_v6 = vpop.f32.mrb[7].mxu0 }
  0xfb   :  { %1192 = vpow2.f32 %v976_v2  ;;  %v981_v8 = vmul.f32 -1.442695, %v1415_v6 }
  0xfc   :  { %v1183_v10 = vpop.eup %1182  ;;  %1194 = vpow2.f32 %v980_v5 }
  0xfd   :  { %v1185_v12 = vpop.eup %1184  ;;  %v408_v13 = vadd.f32 1.0, %v1183_v10  ;;  %1196 = vpow2.f32 %v981_v8 }
  0xfe   :  { %v1187_v14 = vpop.eup %1186  ;;  %v409_v15 = vadd.f32 1.0, %v1185_v12 }
  0xff   :  { %v1189_v16 = vpop.eup %1188  ;;  %1198 = vrcp.f32 %v408_v13  ;;  %v413_v17 = vadd.f32 1.0, %v1187_v14  ;;  %v1422_v18 = vpop.f32.mrb[8].mxu0 }
 0x100   :  { %1200 = vrcp.f32 %v409_v15  ;;  %v414_v19 = vadd.f32 1.0, %v1189_v16  ;;  %v977_v20 = vmul.f32 -1.442695, %v1422_v18  ;;  %v285_v21 = vpop.f32.mrb[9].mxu0  ;;  %v1171_v16 = vld [vmem:[%s1498_s2 + $0x100] sm:$0xff]  }
 0x101   :  { %1202 = vrcp.f32 %v413_v17  ;;  %v1425_v22 = vpop.f32.mrb[10].mxu0 }
 0x102   :  { %1204 = vrcp.f32 %v414_v19  ;;  %v982_v23 = vmul.f32 -1.442695, %v1425_v22  ;;  %v289_v24 = vpop.f32.mrb[11].mxu0 }
 0x103   :  { %1206 = vpow2.f32 %v977_v20 }
 0x104   :  { %v1191_v25 = vpop.eup %1190  ;;  %1208 = vpow2.f32 %v982_v23 }
 0x105   :  { %v1193_v26 = vpop.eup %1192  ;;  %v410_v27 = vadd.f32 1.0, %v1191_v25 }
 0x106   :  { %v1195_v28 = vpop.eup %1194  ;;  %v411_v29 = vadd.f32 1.0, %v1193_v26 }
 0x107   :  { %v1197_v30 = vpop.eup %1196  ;;  %1210 = vrcp.f32 %v410_v27  ;;  %v415_v31 = vadd.f32 1.0, %v1195_v28  ;;  %v369_v32 = vpop.f32.mrb[12].mxu0  ;;  %v1174_v27 = vld [vmem:[%s1498_s2 + $0x108] sm:$0xff]   ;;  %v460_v28 = vld [vmem:[%s1499_s3 + $0x10] ss:$20 sps:$4 sm:$0xff]  }
 0x108   :  { %1212 = vrcp.f32 %v411_v29  ;;  %v416_v33 = vadd.f32 1.0, %v1197_v30  ;;  %v1428_v34 = vpop.f32.mrb[13].mxu0  ;;  %v468_v37 = vunpack.c.l.bf16 %v460_v28 }
 0x109   :  { %v1199_v35 = vpop.eup %1198  ;;  %1214 = vrcp.f32 %v415_v31  ;;  %v373_v38 = vpop.f32.mrb[14].mxu0 }
 0x10a   :  { %v1201_v39 = vpop.eup %1200  ;;  %v438_v40 = vmul.f32 %v1199_v35, %v1394_v55  ;;  %1216 = vrcp.f32 %v416_v33  ;;  %v1437_v41 = vpop.f32.mrb[15].mxu0  ;;  %v1176_v35 = vld [vmem:[%s1498_s2 + $0x110] sm:$0xff]  }
 0x10b   :  { %v1203_v42 = vpop.eup %1202  ;;  %v439_v43 = vmul.f32 %v1201_v39, %v1397_v57  ;;  %v459_v57 = vld [vmem:[%s1499_s3 + $0x8] sm:$0xff] }
 0x10c   :  { %v1205_v44 = vpop.eup %1204  ;;  %v443_v45 = vmul.f32 %v1203_v42, %v1400_v59  ;;  %v448_v46 = vmul.f32 %v438_v40, %v285_v21  ;;  %v466_v14 = vunpack.c.l.bf16 %v459_v57 }
 0x10d   :  { %v1207_v49 = vpop.eup %1206  ;;  %v444_v50 = vmul.f32 %v1205_v44, %v1403_v61  ;;  %v449_v52 = vmul.f32 %v439_v43, %v326_v4  ;;  %v462_v61 = vld [vmem:[%s1499_s3 + $0x1c] sm:$0xff] }
 0x10e   :  { %v1209_v56 = vpop.eup %1208  ;;  %v412_v55 = vadd.f32 1.0, %v1207_v49  ;;  %v453_v58 = vmul.f32 %v443_v45, %v289_v24  ;;  %v474_v0 = vmul.f32 %v464_v47, %v448_v46  ;;  %v471_v21 = vunpack.c.l.bf16 %v462_v61  ;;  %v1178_v44 = vld [vmem:[%s1498_s2 + $0x120] sm:$0xff]   ;;  %v1181_v45 = vld [vmem:[%s1498_s2 + $0x138] sm:$0xff]  }
 0x10f   :  { %v417_v60 = vadd.f32 1.0, %v1209_v56  ;;  %v454_v62 = vmul.f32 %v444_v50, %v330_v9  ;;  %v475_v5 = vmul.f32 %v465_v53, %v449_v52  ;;  %v472_v25 = vunpack.c.h.bf16 %v462_v61 }
 0x110   :  { %1218 = vrcp.f32 %v412_v55  ;;  %v479_v59 = vmul.f32 %v469_v48, %v453_v58 }
 0x111   :  { %v1211_v2 = vpop.eup %1210  ;;  %1220 = vrcp.f32 %v417_v60  ;;  %v480_v8 = vmul.f32 %v470_v54, %v454_v62 }
 0x112   :  { %v1213_v4 = vpop.eup %1212  ;;  %v440_v10 = vmul.f32 %v1211_v2, %v1406_v63  ;;  %v484_v12 = vpack.c.bf16 %v479_v59, %v474_v0  ;;  %v467_v63 = vunpack.c.h.bf16 %v459_v57 }
 0x113   :  { %v1215_v9 = vpop.eup %1214  ;;  %v441_v13 = vmul.f32 %v1213_v4, %v1409_v1  ;;  %v485_v15 = vpack.c.bf16 %v480_v8, %v475_v5 }
 0x114   :  { %v1217_v17 = vpop.eup %1216  ;;  %v445_v19 = vmul.f32 %v1215_v9, %v1412_v3  ;;  %v450_v20 = vmul.f32 %v440_v10, %v1417_v7 }
 0x115   :  { %v446_v23 = vmul.f32 %v1217_v17, %v1415_v6  ;;  %v451_v24 = vmul.f32 %v441_v13, %v369_v32  ;;  %841 = vmatprep.mubr.bf16.mxu1 %v485_v15 }
 0x116   :  { %v455_v1 = vmul.f32 %v445_v19, %v1420_v11  ;;  %842 = vmatmul.mubr.bf16.vlgmr.msra.gmra.mrb[4].mxu1 %v484_v12  ;;  %v476_v3 = vmul.f32 %v466_v14, %v450_v20 }
 0x117   :  { %v456_v26 = vmul.f32 %v446_v23, %v373_v38  ;;  %1086 = vmatpush3.bf16.msra.mxu1 %v1171_v16  ;;  %1101 = vmatprep.mubr.msk.bf16.mxu1 %vm1251_vm1, %v1250_v51  ;;  %v477_v6 = vmul.f32 %v467_v63, %v451_v24  ;;  %v473_v38 = vunpack.c.h.bf16 %v460_v28 }
 0x118   :  { %v481_v7 = vmul.f32 %v471_v21, %v455_v1  ;;  %1087 = vmatprep.subr.bf16.mxu1 %v1250_v51 }
 0x119   :  { %v482_v11 = vmul.f32 %v472_v25, %v456_v26 }
 0x11a   :  { %v1219_v29 = vpop.eup %1218  ;;  %v486_v30 = vpack.c.bf16 %v481_v7, %v476_v3 }
 0x11b   :  { %v1221_v31 = vpop.eup %1220  ;;  %v442_v32 = vmul.f32 %v1219_v29, %v1422_v18  ;;  %1088 = vmatpush3.bf16.msra.mxu1 %v1174_v27  ;;  %v487_v33 = vpack.c.bf16 %v482_v11, %v477_v6  ;;  %v1177_v18 = vld [vmem:[%s1498_s2 + $0x118] sm:$0xff]  }
 0x11c   :  { %v447_v36 = vmul.f32 %v1221_v31, %v1425_v22  ;;  %1089 = vmatprep.subr.bf16.mxu1 %v1250_v51 }
 0x11d   :  { %v452_v39 = vmul.f32 %v442_v32, %v1428_v34  ;;  %882 = vmatprep.mubr.bf16.mxu0 %v487_v33  ;;  %v1179_v34 = vld [vmem:[%s1498_s2 + $0x128] sm:$0xff]  }
 0x11e   :  { %v457_v40 = vmul.f32 %v447_v36, %v1437_v41  ;;  %883 = vmatmul.mubr.bf16.vlgmr.msra.gmra.mrb[16].mxu0 %v486_v30  ;;  %v1180_v41 = vld [vmem:[%s1498_s2 + $0x130] sm:$0xff]  }
 0x11f   :  { %1090 = vmatpush3.bf16.msra.mxu1 %v1176_v35  ;;  %v478_v42 = vmul.f32 %v468_v37, %v452_v39 }
 0x120   :  { %v483_v43 = vmul.f32 %v473_v38, %v457_v40  ;;  %1091 = vmatprep.subr.bf16.mxu1 %v1250_v51 }
 0x122   :  { %v488_v22 = vpack.c.bf16 %v483_v43, %v478_v42 }
 0x123   :  { %1092 = vmatpush3.bf16.msra.mxu1 %v1177_v18 }
 0x124   :  { %1093 = vmatprep.subr.bf16.mxu1 %v1250_v51 }
 0x127   :  { %1094 = vmatpush3.bf16.msra.mxu1 %v1178_v44 }
 0x128   :  { %1095 = vmatprep.subr.bf16.mxu1 %v1250_v51 }
 0x12b   :  { %1096 = vmatpush3.bf16.msra.mxu1 %v1179_v34 }
 0x12c   :  { %1097 = vmatprep.subr.bf16.mxu1 %v1250_v51 }
 0x12f   :  { %1098 = vmatpush3.bf16.msra.mxu1 %v1180_v41 }
 0x130   :  { %1099 = vmatprep.subr.bf16.mxu1 %v1250_v51 }
 0x133   :  { %1100 = vmatpush3.bf16.msra.mxu1 %v1181_v45 }
 0x136   :  { %1102 = vmatmul.mubr.bf16.vlgmr.msra.gmra.mrb[8].mxu1 %v488_v22 }
 0x1e9   :  { %v1048_v46 = vpop.f32.mrb[4].mxu1 }
 0x1ea   :  { %v1049_v47 = vpop.f32.mrb[5].mxu1 }
 0x1eb   :  { %v1050_v48 = vadd.f32 %v1049_v47, %v1048_v46  ;;  %v1051_v49 = vpop.f32.mrb[6].mxu1 }
 0x1ec   :  { %v1052_v50 = vpop.f32.mrb[7].mxu1 }
 0x1ed   :  { %v1053_v52 = vadd.f32 %v1052_v50, %v1051_v49 }
 0x1f1   :  { %v1070_v53 = vpop.f32.mrb[16].mxu0 }
 0x1f2   :  { %v1071_v54 = vpop.f32.mrb[17].mxu0 }
 0x1f3   :  { %v1072_v56 = vadd.f32 %v1071_v54, %v1070_v53  ;;  %v1073_v55 = vpop.f32.mrb[18].mxu0 }
 0x1f4   :  { %v1074_v58 = vpop.f32.mrb[19].mxu0 }
 0x1f5   :  { %v1075_v60 = vadd.f32 %v1074_v58, %v1073_v55  ;;  %v885_v62 = vadd.f32 %v1072_v56, %v1050_v48 }
 0x1f7   :  { %v888_v0 = vadd.f32 %v1075_v60, %v1053_v52 }
 0x209   :  { %v925_v57 = vpop.f32.mrb[8].mxu1 }
 0x20a   :  { %v926_v59 = vadd.f32 %v925_v57, %v885_v62  ;;  %v1103_v2 = vpop.f32.mrb[9].mxu1 }
 0x20b   :  { %v928_v51 = vpop.f32.mrb[10].mxu1 }
 0x20c   :  { %v929_v5 = vadd.f32 %v928_v51, %v888_v0  ;;  %v1104_v8 = vpop.f32.mrb[11].mxu1 }
 0x20e   :  { %v1030_v61 = vpack.c.bf16 %v929_v5, %v926_v59 }
 0x210   :  { %1031 = vst [vmem:[%s1500_s4] sm:$0xff] %v1030_v61  }
 0x211   :  { %946 = vsyncpa [#allocation3], 1 }

</bundles_post_ra>
